<compile_context>
chip_gen: v7x
topology: tpu7x:2x2x1
jax: 0.10.0
libtpu: 0.0.40
codegen_flags: <defaults>
</compile_context>

<pallas_src>
import functools

import jax
import jax.numpy as jnp
from jax import lax
from jax.experimental import pallas as pl
from jax.experimental.pallas import tpu as pltpu

# EPS must stay comfortably above denormals: padded zero rows/columns rely on
# 0 * xv / (0 + EPS) == 0 (and, with approx_reciprocal, on reciprocal(EPS) staying finite).
EPS = 1e-8

_LANE = 128      # lane width (last dim of a vreg)
_SUBLANE = 8     # sublane count (second-to-last dim of an f32 vreg)


def _round_up(a: int, b: int) -> int:
    return ((a + b - 1) // b) * b


@functools.lru_cache(maxsize=None)
def _vmem_budget_bytes() -> int:
    """~75% of physical VMEM: headroom for Mosaic internal scratch / semaphores / spill.

    v7x: 64 MiB -> ~48 MiB;  v5e / v6e: 128 MiB -> ~96 MiB.  Falls back to the v7x floor if the
    hardware query is unavailable (still correct everywhere, just conservative tiles).
    """
    phys = 64 * 1024 * 1024
    try:
        info = pltpu.get_tpu_info()
        for name in ("vmem_capacity_bytes", "vmem_size_bytes", "vmem_bytes"):
            cap = getattr(info, name, None)
            if cap:
                phys = int(cap)
                break
    except Exception:
        pass
    return (phys * 3) // 4


def _plan_tiles(M: int, N: int, RP: int, itemsize: int, budget: int):
    """Pick the M tile (TM) and padded M (MP) from the VMEM budget.

    Uses the fused-step (worst-case) VMEM model so one plan serves every step of a sweep:
      fixed   = v in + v out (double-buffered)  +  f32 scratch (x^T u, v^T v, u^T u)
      per-row = x in + u in + u out (double-buffered), per M row.

    TODO(synk): for very large N (notably v7x's 64 MiB VMEM) even TM=128 with full-N residency
                can exceed the budget; an extra "arbitrary" N grid axis with a (TM, RP) xv
                accumulator (N-tiling) would lift that ceiling.
    TODO(synk): v / v_out could be single-buffered (pipeline_mode=pl.Buffered(1)) since their
                block index is constant over the M axis; left at the default double-buffering
                for portability across jax versions.
    """
    fixed = 4 * N * RP * itemsize                     # v in + v out, double-buffered
    fixed += N * RP * 4 + 2 * RP * RP * 4             # xu, vtv, utu f32 scratch
    per_row = 2 * N * itemsize + 4 * RP * itemsize    # x in + (u in, u out), double-buffered
    avail = max(budget - fixed, 0)

    if M <= _LANE:
        tm = _round_up(max(M, 1), _SUBLANE)           # one (sublane-aligned) tile covers all of M
        return tm, tm

    cands = [c for c in (512, 256, 128) if c * per_row <= avail] or [128]
    for c in cands:                                   # prefer an exact divisor (no padded rows)
        if M % c == 0:
            return c, M
    best = min(cands, key=lambda c: _round_up(M, c))  # least zero-padding; biggest tile on ties
    return best, _round_up(M, best)


def _mu_ratio(num, den, approx: bool):
    """Multiplicative-update ratio num / (den + EPS)."""
    if approx:
        # EUP reciprocal (separate issue slot); ~1e-3 relative error — opt-in only.
        return num * pl.reciprocal(den + EPS, approx=True)
    return num / (den + EPS)


# ---------------------------------------------------------------------------
# Kernels
# ---------------------------------------------------------------------------
def _make_fused_kernel(approx: bool):
    """u update followed by v update (with the new u), one pass over x.

    Refs (batch dim squeezed):
      x: (TM, N)   u: (TM, RP)   v: (N, RP)   u_out: (TM, RP)   v_out: (N, RP)
      vtv_sc: (RP, RP)  xu_sc: (N, RP)  utu_sc: (RP, RP)   [f32 VMEM scratch]
    Grid: (B, MP // TM); B "parallel", M "arbitrary" (reduction axis of the v update).
    """

    def kernel(x_ref, u_ref, v_ref, u_out_ref, v_out_ref, vtv_sc, xu_sc, utu_sc):
        m = pl.program_id(1)
        last_m = pl.num_programs(1) - 1

        x = x_ref[...]          # native dtype straight to the MXU (no full-tile f32 up-cast)
        u = u_ref[...]
        v = v_ref[...]

        @pl.when(m == 0)
        def _init():
            # v^T v is identical for every M tile of a batch: compute once, keep in VMEM.
            vtv_sc[...] = lax.dot_general(v, v, (((0,), (0,)), ((), ())),
                                          preferred_element_type=jnp.float32)
            xu_sc[...] = jnp.zeros_like(xu_sc)
            utu_sc[...] = jnp.zeros_like(utu_sc)

        # ---- u update (NMF multiplicative rule) ----
        xv = jnp.dot(x, v, preferred_element_type=jnp.float32)              # (TM, RP)
        uvtv = jnp.dot(u, vtv_sc[...], preferred_element_type=jnp.float32)  # (TM, RP)
        u_new = _mu_ratio(u * xv, uvtv, approx)                             # f32
        u_out_ref[...] = u_new.astype(u_out_ref.dtype)

        # ---- v-side accumulation over M tiles (transpose-free: contract over the M axis) ----
        u_acc = u_new.astype(x_ref.dtype)
        xu_sc[...] += lax.dot_general(x, u_acc, (((0,), (0,)), ((), ())),
                                      preferred_element_type=jnp.float32)
        utu_sc[...] += lax.dot_general(u_acc, u_acc, (((0,), (0,)), ((), ())),
                                       preferred_element_type=jnp.float32)

        @pl.when(m == last_m)
        def _finalize_v():
            vutu = jnp.dot(v, utu_sc[...], preferred_element_type=jnp.float32)  # (N, RP)
            v_out_ref[...] = _mu_ratio(v * xu_sc[...], vutu, approx).astype(v_out_ref.dtype)

    return kernel


def _make_u_kernel(approx: bool):
    """u update only.  No reduction over M, so both grid axes are megacore-parallel."""

    def kernel(x_ref, u_ref, v_ref, u_out_ref):
        x = x_ref[...]
        u = u_ref[...]
        v = v_ref[...]
        # v^T v recomputed per tile (RP/TM of the x@v work, hidden under the x DMA) so no
        # cross-tile scratch is needed and the M axis can be sharded across TensorCores.
        vtv = lax.dot_general(v, v, (((0,), (0,)), ((), ())),
                              preferred_element_type=jnp.float32)
        xv = jnp.dot(x, v, preferred_element_type=jnp.float32)
        uvtv = jnp.dot(u, vtv, preferred_element_type=jnp.float32)
        u_out_ref[...] = _mu_ratio(u * xv, uvtv, approx).astype(u_out_ref.dtype)

    return kernel


def _make_v_kernel(approx: bool):
    """v update only (with the given u).  M is the reduction axis."""

    def kernel(x_ref, u_ref, v_ref, v_out_ref, xu_sc, utu_sc):
        m = pl.program_id(1)
        last_m = pl.num_programs(1) - 1
        x = x_ref[...]
        u = u_ref[...]

        @pl.when(m == 0)
        def _init():
            xu_sc[...] = jnp.zeros_like(xu_sc)
            utu_sc[...] = jnp.zeros_like(utu_sc)

        xu_sc[...] += lax.dot_general(x, u, (((0,), (0,)), ((), ())),
                                      preferred_element_type=jnp.float32)
        utu_sc[...] += lax.dot_general(u, u, (((0,), (0,)), ((), ())),
                                       preferred_element_type=jnp.float32)

        @pl.when(m == last_m)
        def _finalize_v():
            v = v_ref[...]
            vutu = jnp.dot(v, utu_sc[...], preferred_element_type=jnp.float32)
            v_out_ref[...] = _mu_ratio(v * xu_sc[...], vutu, approx).astype(v_out_ref.dtype)

    return kernel


# ---------------------------------------------------------------------------
# Step wrapper (pre-padded operands) and public API
# ---------------------------------------------------------------------------
def _bcd_padded_step(x, u, v, *, do_u: bool, do_v: bool, tm: int, approx: bool):
    """One BCD step on pre-padded operands.

    x: (B, MP, N), u: (B, MP, RP), v: (B, N, RP) with MP % tm == 0 and RP lane-dense.
    Returns (u_next, v_next); a factor that is not updated is returned unchanged (no
    pass-through HBM write).
    """
    B, MP, N = x.shape
    RP = u.shape[-1]
    assert u.shape == (B, MP, RP) and v.shape == (B, N, RP)
    assert MP % tm == 0
    num_m = MP // tm

    in_specs = [
        pl.BlockSpec((None, tm, N), lambda b, m: (b, m, 0)),    # x tile
        pl.BlockSpec((None, tm, RP), lambda b, m: (b, m, 0)),   # u tile
        pl.BlockSpec((None, N, RP), lambda b, m: (b, 0, 0)),    # full v, fetched once per batch
    ]
    u_out_shape = jax.ShapeDtypeStruct((B, MP, RP), u.dtype)
    u_out_spec = pl.BlockSpec((None, tm, RP), lambda b, m: (b, m, 0))
    v_out_shape = jax.ShapeDtypeStruct((B, N, RP), v.dtype)
    v_out_spec = pl.BlockSpec((None, N, RP), lambda b, m: (b, 0, 0))

    if do_u and do_v:
        kernel = _make_fused_kernel(approx)
        out_shape = (u_out_shape, v_out_shape)
        out_specs = (u_out_spec, v_out_spec)
        scratch = [pltpu.VMEM((RP, RP), jnp.float32),   # v^T v (hoisted, once per batch)
                   pltpu.VMEM((N, RP), jnp.float32),    # sum_m x_m^T @ u_new_m
                   pltpu.VMEM((RP, RP), jnp.float32)]   # sum_m u_new_m^T @ u_new_m
        dims = ("parallel", "arbitrary")
    elif do_u:
        kernel = _make_u_kernel(approx)
        out_shape = u_out_shape
        out_specs = u_out_spec
        scratch = []
        dims = ("parallel", "parallel")   # no reduction over M -> both axes megacore-parallel
    elif do_v:
        kernel = _make_v_kernel(approx)
        out_shape = v_out_shape
        out_specs = v_out_spec
        scratch = [pltpu.VMEM((N, RP), jnp.float32),
                   pltpu.VMEM((RP, RP), jnp.float32)]
        dims = ("parallel", "arbitrary")
    else:
        return u, v

    res = pl.pallas_call(
        kernel,
        out_shape=out_shape,
        grid_spec=pltpu.PrefetchScalarGridSpec(
            num_scalar_prefetch=0,
            grid=(B, num_m),
            in_specs=in_specs,
            out_specs=out_specs,
            scratch_shapes=scratch,
        ),
        compiler_params=pltpu.CompilerParams(
            dimension_semantics=dims,
            vmem_limit_bytes=_vmem_budget_bytes(),
        ),
    )(x, u, v)

    if do_u and do_v:
        u_next, v_next = res
        return u_next, v_next
    if do_u:
        return res, v
    return u, res


def _pad_to(a, axis: int, size: int):
    pad = size - a.shape[axis]
    if pad == 0:
        return a
    widths = [(0, 0)] * a.ndim
    widths[axis] = (0, pad)
    return jnp.pad(a, widths)


def _prepare(x, u, v):
    """Pad the factor dim to a lane-dense RP and M to a multiple of the planned TM.

    Zero rows / columns are exact fixed points of the multiplicative update (0 * xv / (0 + EPS)
    stays 0, and zero rows contribute nothing to x^T u or u^T u), so padding never perturbs the
    real entries and is sliced off only once, at the end of a sweep.
    """
    B, M, N = x.shape
    R = u.shape[-1]
    assert u.shape == (B, M, R) and v.shape == (B, N, R)
    assert u.dtype == x.dtype and v.dtype == x.dtype, "x, u, v must share a dtype"

    RP = _round_up(R, _LANE)   # lane-dense factor dim: unmasked stores, full MXU output width
    tm, MP = _plan_tiles(M, N, RP, jnp.dtype(x.dtype).itemsize, _vmem_budget_bytes())

    x_p = _pad_to(x, 1, MP)
    u_p = _pad_to(_pad_to(u, 2, RP), 1, MP)
    v_p = _pad_to(v, 2, RP)
    return x_p, u_p, v_p, tm, M, R


def update_u(x, u, v, *, approx_reciprocal: bool = False):
    """NMF multiplicative update of u:  u * (x @ v) / (u @ (v^T v) + EPS)."""
    x_p, u_p, v_p, tm, M, R = _prepare(x, u, v)
    u_p, _ = _bcd_padded_step(x_p, u_p, v_p, do_u=True, do_v=False, tm=tm,
                              approx=approx_reciprocal)
    return u_p[:, :M, :R]


def update_v(x, u, v, *, approx_reciprocal: bool = False):
    """update_v(x, u, v) == update_u(x.mT, v, u), computed without materializing x.mT."""
    x_p, u_p, v_p, tm, M, R = _prepare(x, u, v)
    _, v_p = _bcd_padded_step(x_p, u_p, v_p, do_u=False, do_v=True, tm=tm,
                              approx=approx_reciprocal)
    return v_p[:, :, :R]


def bcd_solver_forward(x, factor_matrices, factor=(0, 1), *, approx_reciprocal: bool = False):
    """Equivalent of BCDSolver.forward (with the concrete NMF multiplicative-update rule).

    Consecutive (0, 1) pairs in `factor` are fused into a single pallas_call (one HBM pass over
    x updates both u and v, with v seeing the new u); other orders use the single-update kernels.
    Padding (R -> RP, M -> multiple of TM) is applied once before the sweep and removed once
    after it.
    """
    factor = tuple(int(j) for j in factor)
    assert set(factor).issubset({0, 1}), "`factor` elements must be 0 or 1."
    u, v = factor_matrices
    x_p, u_p, v_p, tm, M, R = _prepare(x, u, v)

    i = 0
    while i < len(factor):
        if i + 1 < len(factor) and factor[i] == 0 and factor[i + 1] == 1:
            u_p, v_p = _bcd_padded_step(x_p, u_p, v_p, do_u=True, do_v=True, tm=tm,
                                        approx=approx_reciprocal)
            i += 2
        elif factor[i] == 0:
            u_p, v_p = _bcd_padded_step(x_p, u_p, v_p, do_u=True, do_v=False, tm=tm,
                                        approx=approx_reciprocal)
            i += 1
        else:
            u_p, v_p = _bcd_padded_step(x_p, u_p, v_p, do_u=False, do_v=True, tm=tm,
                                        approx=approx_reciprocal)
            i += 1
    return u_p[:, :M, :R], v_p[:, :, :R]


# ---------------------------------------------------------------------------
# Reference + self-test
# ---------------------------------------------------------------------------
def _reference_forward(x, factor_matrices, factor=(0, 1)):
    """Pure-JAX reference (exact division) for correctness checking."""

    def upd(x_, u_, v_):
        xv = jnp.einsum("bmn,bnr->bmr", x_, v_)
        vtv = jnp.einsum("bnr,bns->brs", v_, v_)
        uvtv = jnp.einsum("bmr,brs->bms", u_, vtv)
        return u_ * xv / (uvtv + EPS)

    u, v = factor_matrices
    for j in factor:
        if j == 0:
            u = upd(x, u, v)
        else:
            v = upd(jnp.swapaxes(x, -1, -2), v, u)
    return u, v


if __name__ == "__main__":
    B, M, N, R = 2, 16, 16, 8

    key = jax.random.PRNGKey(0)
    kx, ku, kv = jax.random.split(key, 3)
    # Non-negative inputs (NMF-style), deterministic.
    x = jax.random.uniform(kx, (B, M, N), dtype=jnp.float32)
    u0 = jax.random.uniform(ku, (B, M, R), dtype=jnp.float32)
    v0 = jax.random.uniform(kv, (B, N, R), dtype=jnp.float32)

    # 1) Fused (0, 1) sweep: u then v (v sees the new u), one HBM pass over x.
    u1, v1 = bcd_solver_forward(x, (u0, v0), factor=(0, 1))
    u1, v1 = jax.block_until_ready(u1), jax.block_until_ready(v1)
    u1_ref, v1_ref = _reference_forward(x, (u0, v0), factor=(0, 1))
    # Tolerance covers MXU default f32 precision differences vs. the XLA einsum reference.
    assert jnp.allclose(u1, u1_ref, atol=2e-2, rtol=2e-2), "fused: u mismatch vs reference"
    assert jnp.allclose(v1, v1_ref, atol=2e-2, rtol=2e-2), "fused: v mismatch vs reference"

    # 2) (1, 0) order exercises the standalone v-only and u-only kernels.
    u2, v2 = bcd_solver_forward(x, (u0, v0), factor=(1, 0))
    u2, v2 = jax.block_until_ready(u2), jax.block_until_ready(v2)
    u2_ref, v2_ref = _reference_forward(x, (u0, v0), factor=(1, 0))
    assert jnp.allclose(u2, u2_ref, atol=2e-2, rtol=2e-2), "(1,0): u mismatch vs reference"
    assert jnp.allclose(v2, v2_ref, atol=2e-2, rtol=2e-2), "(1,0): v mismatch vs reference"

    # 3) bf16 end-to-end (the production path: halves the dominant HBM traffic for x).
    xb, ub, vb = (a.astype(jnp.bfloat16) for a in (x, u0, v0))
    u3, v3 = bcd_solver_forward(xb, (ub, vb), factor=(0, 1))
    u3, v3 = jax.block_until_ready(u3), jax.block_until_ready(v3)
    u3_ref, v3_ref = _reference_forward(
        xb.astype(jnp.float32),
        (ub.astype(jnp.float32), vb.astype(jnp.float32)),
        factor=(0, 1))
    assert jnp.allclose(u3.astype(jnp.float32), u3_ref, atol=1e-1, rtol=1e-1), "bf16: u mismatch"
    assert jnp.allclose(v3.astype(jnp.float32), v3_ref, atol=1e-1, rtol=1e-1), "bf16: v mismatch"

    print("KERNEL_OK")
</pallas_src>

<mosaic_0001>
module attributes {stable_mosaic.version = 11 : i64} {
  func.func @kernel(%arg0: i32, %arg1: i32, %arg2: memref<1x16x16xf32, #tpu.memory_space<vmem>>, %arg3: memref<1x16x128xf32, #tpu.memory_space<vmem>>, %arg4: memref<1x16x128xf32, #tpu.memory_space<vmem>>, %arg5: memref<1x16x128xf32, #tpu.memory_space<vmem>>, %arg6: memref<1x16x128xf32, #tpu.memory_space<vmem>>, %arg7: memref<128x128xf32, #tpu.memory_space<vmem>>, %arg8: memref<16x128xf32, #tpu.memory_space<vmem>>, %arg9: memref<128x128xf32, #tpu.memory_space<vmem>>) attributes {dimension_semantics = [#tpu.dimension_semantics<parallel>, #tpu.dimension_semantics<arbitrary>], iteration_bounds = array<i64: 2, 1>, scalar_prefetch = 0 : i64, scratch_operands = 3 : i64, tpu.core_type = #tpu.core_type<tc>, window_params = [{transform_indices = @transform_0, window_bounds = array<i64: 1, 16, 16>}, {transform_indices = @transform_1, window_bounds = array<i64: 1, 16, 128>}, {transform_indices = @transform_2, window_bounds = array<i64: 1, 16, 128>}, {transform_indices = @transform_3, window_bounds = array<i64: 1, 16, 128>}, {transform_indices = @transform_4, window_bounds = array<i64: 1, 16, 128>}]} {
    %c0 = arith.constant 0 : index
    %c0_0 = arith.constant 0 : index
    %c0_1 = arith.constant 0 : index
    %0 = vector.load %arg2[%c0, %c0_0, %c0_1] : memref<1x16x16xf32, #tpu.memory_space<vmem>>, vector<1x16x16xf32>
    %1 = vector.shape_cast %0 : vector<1x16x16xf32> to vector<16x16xf32>
    %c0_2 = arith.constant 0 : index
    %c0_3 = arith.constant 0 : index
    %c0_4 = arith.constant 0 : index
    %2 = vector.load %arg3[%c0_2, %c0_3, %c0_4] : memref<1x16x128xf32, #tpu.memory_space<vmem>>, vector<1x16x128xf32>
    %3 = vector.shape_cast %2 : vector<1x16x128xf32> to vector<16x128xf32>
    %c0_5 = arith.constant 0 : index
    %c0_6 = arith.constant 0 : index
    %c0_7 = arith.constant 0 : index
    %4 = vector.load %arg4[%c0_5, %c0_6, %c0_7] : memref<1x16x128xf32, #tpu.memory_space<vmem>>, vector<1x16x128xf32>
    %5 = vector.shape_cast %4 : vector<1x16x128xf32> to vector<16x128xf32>
    %c0_i32 = arith.constant 0 : i32
    %6 = arith.cmpi eq, %arg1, %c0_i32 : i32
    %7 = arith.extui %6 : i1 to i32
    %c0_i32_8 = arith.constant 0 : i32
    %8 = arith.cmpi ne, %7, %c0_i32_8 : i32
    scf.if %8 {
      %cst_28 = arith.constant dense<0.000000e+00> : vector<128x128xf32>
      %30 = tpu.matmul %5, %5, %cst_28 {dimension_numbers = #tpu.dot_dimension_numbers<[0], [0], [1], [1], [0, 1, 1, 1], [], []>} : vector<16x128xf32>, vector<16x128xf32>, vector<128x128xf32> -> vector<128x128xf32>
      %c0_29 = arith.constant 0 : index
      %c0_30 = arith.constant 0 : index
      %31 = vector.load %arg7[%c0_29, %c0_30] : memref<128x128xf32, #tpu.memory_space<vmem>>, vector<128x128xf32>
      tpu.vector_store %arg7[%c0_29, %c0_30], %30 {strides = array<i32>} : memref<128x128xf32, #tpu.memory_space<vmem>>, vector<128x128xf32>,
      %cst_31 = arith.constant 0.000000e+00 : f32
      %32 = vector.broadcast %cst_31 : f32 to vector<16x128xf32>
      %c0_32 = arith.constant 0 : index
      %c0_33 = arith.constant 0 : index
      %33 = vector.load %arg8[%c0_32, %c0_33] : memref<16x128xf32, #tpu.memory_space<vmem>>, vector<16x128xf32>
      tpu.vector_store %arg8[%c0_32, %c0_33], %32 {strides = array<i32>} : memref<16x128xf32, #tpu.memory_space<vmem>>, vector<16x128xf32>,
      %cst_34 = arith.constant 0.000000e+00 : f32
      %34 = vector.broadcast %cst_34 : f32 to vector<128x128xf32>
      %c0_35 = arith.constant 0 : index
      %c0_36 = arith.constant 0 : index
      %35 = vector.load %arg9[%c0_35, %c0_36] : memref<128x128xf32, #tpu.memory_space<vmem>>, vector<128x128xf32>
      tpu.vector_store %arg9[%c0_35, %c0_36], %34 {strides = array<i32>} : memref<128x128xf32, #tpu.memory_space<vmem>>, vector<128x128xf32>,
    } else {
    }
    %cst = arith.constant dense<0.000000e+00> : vector<16x128xf32>
    %9 = tpu.matmul %1, %5, %cst {dimension_numbers = #tpu.dot_dimension_numbers<[1], [0], [0], [1], [0, 0, 1, 1], [], []>} : vector<16x16xf32>, vector<16x128xf32>, vector<16x128xf32> -> vector<16x128xf32>
    %c0_9 = arith.constant 0 : index
    %c0_10 = arith.constant 0 : index
    %10 = vector.load %arg7[%c0_9, %c0_10] : memref<128x128xf32, #tpu.memory_space<vmem>>, vector<128x128xf32>
    %cst_11 = arith.constant dense<0.000000e+00> : vector<16x128xf32>
    %11 = tpu.matmul %3, %10, %cst_11 {dimension_numbers = #tpu.dot_dimension_numbers<[1], [0], [0], [1], [0, 0, 1, 1], [], []>} : vector<16x128xf32>, vector<128x128xf32>, vector<16x128xf32> -> vector<16x128xf32>
    %12 = arith.mulf %3, %9 : vector<16x128xf32>
    %cst_12 = arith.constant 9.99999993E-9 : f32
    %13 = vector.broadcast %cst_12 : f32 to vector<16x128xf32>
    %14 = arith.addf %11, %13 : vector<16x128xf32>
    %15 = arith.divf %12, %14 : vector<16x128xf32>
    %c0_13 = arith.constant 0 : index
    %c0_14 = arith.constant 0 : index
    %c0_15 = arith.constant 0 : index
    %16 = vector.load %arg5[%c0_13, %c0_14, %c0_15] : memref<1x16x128xf32, #tpu.memory_space<vmem>>, vector<1x16x128xf32>
    %17 = vector.shape_cast %16 : vector<1x16x128xf32> to vector<16x128xf32>
    %18 = vector.shape_cast %15 : vector<16x128xf32> to vector<1x16x128xf32>
    tpu.vector_store %arg5[%c0_13, %c0_14, %c0_15], %18 {strides = array<i32>} : memref<1x16x128xf32, #tpu.memory_space<vmem>>, vector<1x16x128xf32>,
    %c0_16 = arith.constant 0 : index
    %c0_17 = arith.constant 0 : index
    %19 = vector.load %arg8[%c0_16, %c0_17] : memref<16x128xf32, #tpu.memory_space<vmem>>, vector<16x128xf32>
    %cst_18 = arith.constant dense<0.000000e+00> : vector<16x128xf32>
    %20 = tpu.matmul %1, %15, %cst_18 {dimension_numbers = #tpu.dot_dimension_numbers<[0], [0], [1], [1], [0, 1, 1, 1], [], []>} : vector<16x16xf32>, vector<16x128xf32>, vector<16x128xf32> -> vector<16x128xf32>
    %21 = arith.addf %19, %20 : vector<16x128xf32>
    %c0_19 = arith.constant 0 : index
    %c0_20 = arith.constant 0 : index
    %22 = vector.load %arg8[%c0_19, %c0_20] : memref<16x128xf32, #tpu.memory_space<vmem>>, vector<16x128xf32>
    tpu.vector_store %arg8[%c0_19, %c0_20], %21 {strides = array<i32>} : memref<16x128xf32, #tpu.memory_space<vmem>>, vector<16x128xf32>,
    %c0_21 = arith.constant 0 : index
    %c0_22 = arith.constant 0 : index
    %23 = vector.load %arg9[%c0_21, %c0_22] : memref<128x128xf32, #tpu.memory_space<vmem>>, vector<128x128xf32>
    %cst_23 = arith.constant dense<0.000000e+00> : vector<128x128xf32>
    %24 = tpu.matmul %15, %15, %cst_23 {dimension_numbers = #tpu.dot_dimension_numbers<[0], [0], [1], [1], [0, 1, 1, 1], [], []>} : vector<16x128xf32>, vector<16x128xf32>, vector<128x128xf32> -> vector<128x128xf32>
    %25 = arith.addf %23, %24 : vector<128x128xf32>
    %c0_24 = arith.constant 0 : index
    %c0_25 = arith.constant 0 : index
    %26 = vector.load %arg9[%c0_24, %c0_25] : memref<128x128xf32, #tpu.memory_space<vmem>>, vector<128x128xf32>
    tpu.vector_store %arg9[%c0_24, %c0_25], %25 {strides = array<i32>} : memref<128x128xf32, #tpu.memory_space<vmem>>, vector<128x128xf32>,
    %c0_i32_26 = arith.constant 0 : i32
    %27 = arith.cmpi eq, %arg1, %c0_i32_26 : i32
    %28 = arith.extui %27 : i1 to i32
    %c0_i32_27 = arith.constant 0 : i32
    %29 = arith.cmpi ne, %28, %c0_i32_27 : i32
    scf.if %29 {
      %c0_28 = arith.constant 0 : index
      %c0_29 = arith.constant 0 : index
      %30 = vector.load %arg9[%c0_28, %c0_29] : memref<128x128xf32, #tpu.memory_space<vmem>>, vector<128x128xf32>
      %cst_30 = arith.constant dense<0.000000e+00> : vector<16x128xf32>
      %31 = tpu.matmul %5, %30, %cst_30 {dimension_numbers = #tpu.dot_dimension_numbers<[1], [0], [0], [1], [0, 0, 1, 1], [], []>} : vector<16x128xf32>, vector<128x128xf32>, vector<16x128xf32> -> vector<16x128xf32>
      %c0_31 = arith.constant 0 : index
      %c0_32 = arith.constant 0 : index
      %32 = vector.load %arg8[%c0_31, %c0_32] : memref<16x128xf32, #tpu.memory_space<vmem>>, vector<16x128xf32>
      %33 = arith.mulf %5, %32 : vector<16x128xf32>
      %cst_33 = arith.constant 9.99999993E-9 : f32
      %34 = vector.broadcast %cst_33 : f32 to vector<16x128xf32>
      %35 = arith.addf %31, %34 : vector<16x128xf32>
      %36 = arith.divf %33, %35 : vector<16x128xf32>
      %c0_34 = arith.constant 0 : index
      %c0_35 = arith.constant 0 : index
      %c0_36 = arith.constant 0 : index
      %37 = vector.load %arg6[%c0_34, %c0_35, %c0_36] : memref<1x16x128xf32, #tpu.memory_space<vmem>>, vector<1x16x128xf32>
      %38 = vector.shape_cast %37 : vector<1x16x128xf32> to vector<16x128xf32>
      %39 = vector.shape_cast %36 : vector<16x128xf32> to vector<1x16x128xf32>
      tpu.vector_store %arg6[%c0_34, %c0_35, %c0_36], %39 {strides = array<i32>} : memref<1x16x128xf32, #tpu.memory_space<vmem>>, vector<1x16x128xf32>,
    } else {
    }
    return
  }
  func.func @transform_0(%arg0: i32, %arg1: i32) -> (i32, i32, i32) {
    %c0_i32 = arith.constant 0 : i32
    %c0_i32_0 = arith.constant 0 : i32
    return %arg0, %arg1, %c0_i32 : i32, i32, i32
  }
  func.func @transform_1(%arg0: i32, %arg1: i32) -> (i32, i32, i32) {
    %c0_i32 = arith.constant 0 : i32
    %c0_i32_0 = arith.constant 0 : i32
    return %arg0, %arg1, %c0_i32 : i32, i32, i32
  }
  func.func @transform_2(%arg0: i32, %arg1: i32) -> (i32, i32, i32) {
    %c0_i32 = arith.constant 0 : i32
    %c0_i32_0 = arith.constant 0 : i32
    %c0_i32_1 = arith.constant 0 : i32
    return %arg0, %c0_i32, %c0_i32_0 : i32, i32, i32
  }
  func.func @transform_3(%arg0: i32, %arg1: i32) -> (i32, i32, i32) {
    %c0_i32 = arith.constant 0 : i32
    %c0_i32_0 = arith.constant 0 : i32
    return %arg0, %arg1, %c0_i32 : i32, i32, i32
  }
  func.func @transform_4(%arg0: i32, %arg1: i32) -> (i32, i32, i32) {
    %c0_i32 = arith.constant 0 : i32
    %c0_i32_0 = arith.constant 0 : i32
    %c0_i32_1 = arith.constant 0 : i32
    return %arg0, %c0_i32, %c0_i32_0 : i32, i32, i32
  }
}

</mosaic_0001>

<bundles_post_ra>
// kernel: tpu_custom_call.1
= control target key start
LH: loop header
LB: loop body
LE: loop exit
PB: predicated region body
PF: predicated region fallthrough
CT: control target
= control target key end

     0   :  { %s2567_s0 = inlined_call_operand.hbm [shape: f32[2,16,16], index: 0, kind: input, shape index: {}]   ;;  %s2568_s1 = inlined_call_operand.hbm [shape: f32[2,16,128], index: 1, kind: input, shape index: {}]   ;;  %s2569_s2 = inlined_call_operand.hbm [shape: f32[2,16,128], index: 2, kind: input, shape index: {}]   ;;  %s2570_s3 = inlined_call_operand.hbm [shape: f32[2,16,128], index: 3, kind: output, shape index: {0}]   ;;  %s2571_s4 = inlined_call_operand.hbm [shape: f32[2,16,128], index: 4, kind: output, shape index: {1}]  }
   0x1   :  { %2583 = sst [smem:[#allocation22_spill]] %s2568_s1 }
   0x2   :  { %10 = vsyncpa [#allocation6], 0 }
   0x3   :  { %12 = vsyncpa [#allocation6 + $0x1], 0 }
   0x4   :  { %13 = vsyncpa [#allocation9], 0 }
   0x5   :  { %15 = vsyncpa [#allocation9 + $0x1], 0 }
   0x6   :  { %16 = vsyncpa [#allocation7], 0 }
   0x7   :  { %18 = vsyncpa [#allocation7 + $0x1], 0 }
   0x8   :  { %19 = vsyncpa [#allocation13], 0 }
   0x9   :  { %21 = vsyncpa [#allocation13 + $0x1], 0  ;;  %s2180_s15 = smov 0   ;;  %s2182_s16 = smov 0  }
   0xa   :  { %s2184_s17 = smov 0   ;;  %s2186_s18 = smov 0  }
   0xb   :  { %s2188_s19 = smov 0   ;;  %s2190_s20 = smov 0  }
   0xc LB: > { %2584 = sst [smem:[#allocation18_spill]] %s2140_s19  ;;  %s2211_s21 = sadd.s32 4294967295, %s2144_s20   ;;  %s2144_s20 = sphi %s2190_s20, %s27_s20   ;;  %s2140_s19 = sphi %s2188_s19, %s2609_s19   ;;  %s2136_s18 = sphi %s2186_s18, %s2608_s18   ;;  %s2132_s17 = sphi %s2184_s17, %s2612_s17   ;;  %s2128_s16 = sphi %s2182_s16, %s2611_s16   ;;  %s2124_s15 = sphi %s2180_s15, %s2610_s15  }
   0xd   : > { %2585 = sst [smem:[#allocation19_spill]] %s2144_s20  ;;  %s1479_s22 = sadd.s32 4294967294, %s2144_s20  }
   0xe   : > { %s39_s23 = sadd.s32 1, %s2140_s19  ;;  %s48_s24 = sadd.s32 1, %s2132_s17 }
   0xf   : > { %p41_p0 = scmp.ge.s32.totalorder %s39_s23, 2  ;;  %p55_p1 = scmp.ne.s32.totalorder %s2132_s17, %s2128_s16 }
  0x10   : > { %p56_p2 = scmp.eq.s32.totalorder %s2144_s20, 0  ;;  %p61_p3 = scmp.ne.s32.totalorder %s2128_s16, %s2124_s15 }
  0x11   : > { %s2614_s23 = smov (%p41_p0, %s39_s23), 0  ;;  %p62_p5 = scmp.eq.s32.totalorder %s2211_s21, 0 }
  0x12   : > { %2586 = sst [smem:[#allocation20_spill]] %s2614_s23  ;;  %p2223_p4 = por %p56_p2, %p55_p1 }
  0x13   : > { %s43_s26 = ssub.s32 %s2140_s19, %s2614_s23  ;;  %p141_p6 = scmp.eq.s32.totalorder %s2211_s21, 1 }
  0x14   : > { %p46_p7 = scmp.eq.s32.totalorder %s43_s26, 0  ;;  %p2231_p8 = por %p62_p5, %p61_p3 }
  0x15   : > { %p2235_p9 = por %p141_p6, %p55_p1  ;;  %p147_p10 = scmp.eq.s32.totalorder %s1479_s22, 1 }
  0x16   : > { %s2588_s27 = scalar_select %p2231_p8, 1, 0 }
  0x17   : > { %s2589_s28 = scalar_select %p2235_p9, 1, 0 }
  0x18   : > { %s2240_s29 = scalar_select %p46_p7, %s2132_s17, %s48_s24  }
  0x19   : > { %p2242_p11 = por %p147_p10, %p61_p3  ;;  %p1873_p13 = scmp.lt.s32.totalorder %s2144_s20, 2 }
  0x1a   : > { %2590 = sst [smem:[#allocation21_spill]] %s2240_s29  ;;  %s2572_s5 = sand.u32 1, %s2132_s17  }
  0x1b   : > { %s2591_s30 = scalar_select %p2242_p11, 1, 0 }
  0x1c   : > { %s2251_s6 = sshll.u32 %s2572_s5, 4  ;;  %s2254_s7 = sshll.u32 %s2140_s19, 8 }
  0x1d   : > { %p2258_p0 = pnand %p1873_p13, %p2223_p4  ;;  %s216_s9 = sand.u32 1, %s2144_s20  }
  0x1e   : > { %s2593_s1 = sld [smem:[#allocation22_spill]]  ;;  %s220_s13 = scalar_lea.vmem [#allocation8], %s2251_s6 }
  0x1f   : > { %s229_s14 = sshll.u32 %s220_s13, 4  ;;  %s2274_s22 = scalar_lea.sflag [#allocation9], %s216_s9  ;;  %s2271_s14 = int_to_ptr.vmem [resolvable:$true] %s229_s14 }
  0x20   : > { %p2280_p4 = pneg %p2258_p0 }
  0x24   : > { %s2267_s12 = scalar_lea.hbm %s2593_s1, %s2254_s7  ;;  %s1941_s11 = scalar_lea.hbm %s2593_s1, 512 }
  0x25   : > { %s1936_s24 = scalar_lea.hbm %s2267_s12, 256  ;;  %p1942_p7 = scmp.lt.u32.totalorder %s2267_s12, %s2593_s1 }
  0x26   : > { %p1937_p3 = scmp.ne.s32.totalorder %s2267_s12, %s1936_s24  ;;  %p1943_p10 = scmp.lt.u32.totalorder %s1941_s11, %s1936_s24 }
  0x27   : > { %p1945_p12 = scmp.lt.u32.totalorder %s1936_s24, %s2267_s12 }
  0x28   : > { %p1939_p5 = pnand %p2280_p4, %p1937_p3  ;;  %p1944_p13 = por %p1943_p10, %p1942_p7 }
  0x2a   : > { %p1940_p6 = pneg %p1939_p5  ;;  %p1946_p1 = por %p1945_p12, %p1944_p13 }
  0x2c   : > { %p1947_p2 = pnand %p1946_p1, %p1940_p6 }
  0x2e   : > { %1950 = shalt.err (!%p1947_p2)
}
  0x2f   : > { %s1951_s9 = scalar_lea.vmem %s2271_s14, 256  ;;  %s2146_s26 = smov [#allocation8]  }
  0x30   : > { %p1952_p3 = scmp.ne.s32.totalorder %s2271_s14, %s1951_s9  ;;  %s1956_s10 = sshll.u32 %s2146_s26, 4  ;;  %s1957_s10 = int_to_ptr.vmem [resolvable:$false] %s1956_s10 }
  0x31   : > { %s1958_s5 = scalar_lea.vmem %s1957_s10, 512  ;;  %p1959_p9 = scmp.lt.s32.totalorder %s2271_s14, %s1957_s10 }
  0x32   : > { %p1954_p5 = pnand %p1952_p3, %p2280_p4  ;;  %p1960_p8 = scmp.lt.s32.totalorder %s1958_s5, %s1951_s9 }
  0x34   : > { %p1955_p11 = pneg %p1954_p5  ;;  %p1961_p7 = por %p1960_p8, %p1959_p9 }
  0x36   : > { %p1962_p10 = pnand %p1961_p7, %p1955_p11 }
  0x38   : > { %1965 = shalt.err (!%p1962_p10)
}
  0x39   : > { %s2575_s24 = smov 128   ;;  %s2577_s11 = smov 8  }
  0x3a   : > { %1862 = dma.hbm_to_vmem [thread:$0]  (!%p2258_p0), %s2267_s12, 256, %s2271_s14, %s2274_s22, %s2575_s24, %s2575_s24, %s2577_s11  }
  0x3b   : > { %p2595_p8 = scmp.lt.s32.totalorder %s2144_s20, 3  ;;  %p2596_p9 = scmp.ge.s32.totalorder %s2144_s20, 1 }
  0x3c   : > { %s2319_s10 = scalar_lea.hbm %s2567_s0, %s2254_s7  ;;  %s197_s5 = scalar_lea.vmem [#allocation5], %s2251_s6 }
  0x3d   : > { %p2311_p11 = pnand %p2596_p9, %p2595_p8  ;;  %s206_s1 = sshll.u32 %s197_s5, 4  ;;  %s2322_s1 = int_to_ptr.vmem [resolvable:$true] %s206_s1 }
  0x3e   : > { %s2328_s24 = scalar_lea.hbm %s2569_s2, %s2254_s7  ;;  %s2598_s11 = sand.u32 1, %s2132_s17  }
  0x3f   : > { %s2597_s13 = scalar_select %p2311_p11, 1, 0 }
  0x40   : > { %s2332_s23 = scalar_lea.sflag [#allocation6], %s2598_s11  ;;  %s1966_s19 = scalar_lea.hbm %s2319_s10, 256 }
  0x41   : > { %p1967_p12 = scmp.ne.s32.totalorder %s2319_s10, %s1966_s19  ;;  %s1971_s29 = scalar_lea.hbm %s2567_s0, 512 }
  0x42   : > { %p1972_p6 = scmp.lt.u32.totalorder %s2319_s10, %s2567_s0  ;;  %p1973_p13 = scmp.lt.u32.totalorder %s1971_s29, %s1966_s19 }
  0x43   : > { %p1969_p1 = pnand %p1967_p12, %p2280_p4  ;;  %p1975_p5 = scmp.lt.u32.totalorder %s1966_s19, %s2319_s10 }
  0x44   : > { %p1974_p3 = por %p1973_p13, %p1972_p6 }
  0x45   : > { %p1970_p2 = pneg %p1969_p1 }
  0x46   : > { %p1976_p7 = por %p1975_p5, %p1974_p3 }
  0x48   : > { %p1977_p10 = pnand %p1976_p7, %p1970_p2 }
  0x4a   : > { %1980 = shalt.err (!%p1977_p10)
}
  0x4b   : > { %s1981_s7 = scalar_lea.vmem %s2322_s1, 256  ;;  %s2149_s11 = smov [#allocation5]  }
  0x4c   : > { %p1982_p8 = scmp.ne.s32.totalorder %s2322_s1, %s1981_s7  ;;  %s1986_s12 = sshll.u32 %s2149_s11, 4  ;;  %s1987_s12 = int_to_ptr.vmem [resolvable:$false] %s1986_s12 }
  0x4d   : > { %s1988_s20 = scalar_lea.vmem %s1987_s12, 512  ;;  %p1989_p1 = scmp.lt.s32.totalorder %s2322_s1, %s1987_s12 }
  0x4e   : > { %p1984_p9 = pnand %p1982_p8, %p2280_p4  ;;  %p1990_p11 = scmp.lt.s32.totalorder %s1988_s20, %s1981_s7 }
  0x50   : > { %p1985_p12 = pneg %p1984_p9  ;;  %p1991_p6 = por %p1990_p11, %p1989_p1 }
  0x52   : > { %p1992_p13 = pnand %p1991_p6, %p1985_p12 }
  0x54   : > { %1995 = shalt.err (!%p1992_p13)
}
  0x55   : > { %s2599_s19 = smov 8   ;;  %s2600_s29 = smov 128  }
  0x56   : > { %1859 = dma.hbm_to_vmem [thread:$0]  (!%p2258_p0), %s2319_s10, 256, %s2322_s1, %s2332_s23, %s2600_s29, %s2600_s29, %s2599_s19  }
  0x57   : > { %s243_s14 = scalar_lea.vmem [#allocation10], %s2251_s6  ;;  %s1996_s26 = scalar_lea.hbm %s2328_s24, 256 }
  0x58   : > { %s250_s9 = sshll.u32 %s243_s14, 4  ;;  %p1997_p11 = scmp.ne.s32.totalorder %s2328_s24, %s1996_s26  ;;  %s2360_s9 = int_to_ptr.vmem [resolvable:$true] %s250_s9 }
  0x59   : > { %s2001_s11 = scalar_lea.hbm %s2569_s2, 512  ;;  %p2002_p5 = scmp.lt.u32.totalorder %s2328_s24, %s2569_s2 }
  0x5a   : > { %p1999_p2 = pnand %p1997_p11, %p2280_p4  ;;  %p2003_p7 = scmp.lt.u32.totalorder %s2001_s11, %s1996_s26 }
  0x5b   : > { %p2005_p8 = scmp.lt.u32.totalorder %s1996_s26, %s2328_s24 }
  0x5c   : > { %p2000_p3 = pneg %p1999_p2  ;;  %p2004_p10 = por %p2003_p7, %p2002_p5 }
  0x5e   : > { %p2006_p9 = por %p2005_p8, %p2004_p10 }
  0x60   : > { %p2007_p12 = pnand %p2006_p9, %p2000_p3 }
  0x62   : > { %2010 = shalt.err (!%p2007_p12)
}
  0x63   : > { %s2011_s1 = scalar_lea.vmem %s2360_s9, 256  ;;  %s2150_s23 = smov [#allocation10]  }
  0x64   : > { %p2012_p1 = scmp.ne.s32.totalorder %s2360_s9, %s2011_s1  ;;  %s2016_s6 = sshll.u32 %s2150_s23, 4  ;;  %s2017_s6 = int_to_ptr.vmem [resolvable:$false] %s2016_s6 }
  0x65   : > { %s2018_s10 = scalar_lea.vmem %s2017_s6, 512  ;;  %p2019_p11 = scmp.lt.s32.totalorder %s2360_s9, %s2017_s6 }
  0x66   : > { %p2014_p6 = pnand %p2012_p1, %p2280_p4  ;;  %p2020_p2 = scmp.lt.s32.totalorder %s2018_s10, %s2011_s1 }
  0x68   : > { %p2015_p13 = pneg %p2014_p6  ;;  %p2021_p5 = por %p2020_p2, %p2019_p11 }
  0x6a   : > { %p2022_p7 = pnand %p2021_p5, %p2015_p13 }
  0x6c   : > { %2025 = shalt.err (!%p2022_p7)
}
  0x6d   : > { %1865 = dma.hbm_to_vmem [thread:$0]  (!%p2258_p0), %s2328_s24, 256, %s2360_s9, %s2274_s22, %s2600_s29, %s2600_s29, %s2599_s19  }
  0x6e   : > { %p2601_p4 = scmp.ne.s32.totalorder %s2597_s13, 0 }
  0x6f   : > { %s2390_s25 = sand.u32 (!%p2601_p4), 1, %s2128_s16   ;;  %p2602_p3 = scmp.ne.s32.totalorder (!%p2601_p4), %s2588_s27, 0 }
  0x70   : > { %262 = sbr.rel (%p2601_p4) target bundleno = 1411 (0x583), region = 32  ;;  %s2393_s14 = sshll.u32 (!%p2601_p4), %s2390_s25, 4 }
  0x71   : > { %s265_s8 = scalar_lea.sflag (!%p2601_p4), [#allocation6], %s2390_s25  ;;  %s268_s26 = scalar_lea.vmem (!%p2601_p4), [#allocation5], %s2393_s14 }
  0x77   : > { %2107 = dma.done.wait (%p2602_p3), %s265_s8, 256  }
  0x78   : > { %2109 = vsyncadd (%p2602_p3), %s265_s8, 4294967040  ;;  %s273_s22 = sand.u32 1, %s2211_s21   ;;  %s277_s13 = scalar_lea.vmem [#allocation8], %s2393_s14 }
  0x79   : > { %s274_s24 = scalar_lea.sflag [#allocation9], %s273_s22 }
  0x7a   : > { %2111 = dma.done.wait (%p2602_p3), %s274_s24, 512  }
  0x7b   : > { %2113 = vsyncadd (%p2602_p3), %s274_s24, 4294966784  ;;  %s286_s19 = scalar_lea.vmem [#allocation10], %s2393_s14  ;;  %vm371_vm0 = vcmask 130048   ;;  %v331_v19 = vld [vmem:[%s277_s13] sm:$0xff]  ;;  %v330_v21 = vld [vmem:[%s268_s26 + $0x8] sm:$0xff]  ;;  %s2443_s21 = scalar_lea.vmem [#allocation11], %s2393_s14 }
  0x7c   : > { %v2408_v0 = vld [vmem:[%s286_s19] sm:$0xff]  ;;  %v2410_v1 = vld [vmem:[%s286_s19 + $0x8] sm:$0xff]  ;;  %s1297_s27 = sshll.u32 %s2443_s21, 4  ;;  %s1544_s29 = sshll.u32 %s2136_s18, 8  ;;  %s2469_s27 = int_to_ptr.vmem [resolvable:$true] %s1297_s27 }
  0x7d   : > { %339 = vxpose.xlu0.b32.start [1/2] (short) %v2408_v0, 128  ;;  %v1766_v2 = vpack.c.bf16 %v2410_v1, %v2408_v0  ;;  %v329_v20 = vld [vmem:[%s268_s26] sm:$0xff]  ;;  %v332_v46 = vld [vmem:[%s277_s13 + $0x8] sm:$0xff]  ;;  %s2476_s7 = scalar_lea.hbm %s2570_s3, %s1544_s29  ;;  %s1277_s11 = scalar_lea.sflag [#allocation7], %s2390_s25 }
  0x7e   : > { %1658 = vmatprep.mubr.msk.f32.mxu1 %vm371_vm0, %v329_v20  ;;  %s2026_s12 = scalar_lea.vmem %s2469_s27, 256  ;;  %p2603_p10 = scmp.ne.s32.totalorder %s2589_s28, 0 }
  0x7f   : > { %1767 = vmatprep.subr.bf16.mxu0 %v1766_v2  ;;  %1771 = vmatprep.subr.bf16.mxu1 %v1766_v2  ;;  %p2027_p0 = scmp.ne.s32.totalorder %s2469_s27, %s2026_s12  ;;  %s2151_s20 = smov [#allocation11]  }
  0x80   : > { %1769 = vmatpush3.bf16.msra.mxu0 %v1766_v2  ;;  %1773 = vmatpush3.bf16.msra.mxu1 %v1766_v2  ;;  %s2030_s1 = sshll.u32 %s2151_s20, 4  ;;  %s2031_s1 = int_to_ptr.vmem [resolvable:$false] %s2030_s1 }
  0x81   : > { %340 = vxpose.xlu0.b32.end [2/2] (short) %v2410_v1, 128  ;;  %p2028_p8 = pnand %p2027_p0, %p2603_p10  ;;  %s2032_s23 = scalar_lea.vmem %s2031_s1, 512 }
  0x82   : > { %p2033_p12 = scmp.lt.s32.totalorder %s2469_s27, %s2031_s1  ;;  %p2034_p1 = scmp.lt.s32.totalorder %s2032_s23, %s2026_s12 }
  0x83   : > { %1659 = vmatmul.mubr.msk.f32.vlgmr.msra.gmra.mrb[0].mxu1 %vm371_vm0, %v330_v21  ;;  %p2029_p9 = pneg %p2028_p8 }
  0x84   : > { %p2035_p6 = por %p2034_p1, %p2033_p12 }
  0x86   : > { %p2036_p13 = pnand %p2035_p6, %p2029_p9 }
  0xba   : > { %782 = vxpose.xlu0.b32.start [1/2] (short) (narrow) %v329_v20, 16 }
  0xbe   : > { %783 = vxpose.xlu0.b32.end [2/2] (short) (narrow) %v330_v21, 16 }
  0xfd   : > { %v355_v3 = vpop.trf.xlu0 }
  0xfe   : > { %1630 = vmatprep.mubr.msk.f32.mxu0 %vm371_vm0, %v355_v3 }
 0x101   : > { %v356_v4 = vpop.trf.xlu0 }
 0x102   : > { %1631 = vmatmul.mubr.msk.f32.vlgmr.msra.gmra.mrb[0].mxu0 %vm371_vm0, %v356_v4 }
 0x105   : > { %v357_v5 = vpop.trf.xlu0 }
 0x106   : > { %1633 = vmatprep.mubr.msk.f32.mxu0 %vm371_vm0, %v357_v5 }
 0x109   : > { %v358_v6 = vpop.trf.xlu0 }
 0x10a   : > { %1634 = vmatmul.mubr.msk.f32.gmra.mrb[2].mxu0 %vm371_vm0, %v358_v6 }
 0x10d   : > { %v359_v7 = vpop.trf.xlu0 }
 0x10e   : > { %1636 = vmatprep.mubr.msk.f32.mxu0 %vm371_vm0, %v359_v7 }
 0x111   : > { %v360_v8 = vpop.trf.xlu0 }
 0x112   : > { %1637 = vmatmul.mubr.msk.f32.gmra.mrb[4].mxu0 %vm371_vm0, %v360_v8 }
 0x115   : > { %v361_v9 = vpop.trf.xlu0 }
 0x116   : > { %1639 = vmatprep.mubr.msk.f32.mxu0 %vm371_vm0, %v361_v9 }
 0x119   : > { %v362_v10 = vpop.trf.xlu0 }
 0x11a   : > { %1640 = vmatmul.mubr.msk.f32.gmra.mrb[6].mxu0 %vm371_vm0, %v362_v10 }
 0x11d   : > { %v363_v11 = vpop.trf.xlu0 }
 0x11e   : > { %1642 = vmatprep.mubr.msk.f32.mxu0 %vm371_vm0, %v363_v11 }
 0x121   : > { %v364_v12 = vpop.trf.xlu0 }
 0x122   : > { %1643 = vmatmul.mubr.msk.f32.gmra.mrb[8].mxu0 %vm371_vm0, %v364_v12 }
 0x125   : > { %v365_v13 = vpop.trf.xlu0 }
 0x126   : > { %1645 = vmatprep.mubr.msk.f32.mxu0 %vm371_vm0, %v365_v13 }
 0x129   : > { %v366_v14 = vpop.trf.xlu0 }
 0x12a   : > { %1646 = vmatmul.mubr.msk.f32.gmra.mrb[10].mxu0 %vm371_vm0, %v366_v14 }
 0x12d   : > { %v367_v15 = vpop.trf.xlu0 }
 0x12e   : > { %1648 = vmatprep.mubr.msk.f32.mxu0 %vm371_vm0, %v367_v15 }
 0x131   : > { %v368_v16 = vpop.trf.xlu0 }
 0x132   : > { %1649 = vmatmul.mubr.msk.f32.gmra.mrb[12].mxu0 %vm371_vm0, %v368_v16 }
 0x135   : > { %v369_v17 = vpop.trf.xlu0 }
 0x136   : > { %1651 = vmatprep.mubr.msk.f32.mxu0 %vm371_vm0, %v369_v17 }
 0x139   : > { %v370_v18 = vpop.trf.xlu0 }
 0x13a   : > { %1652 = vmatmul.mubr.msk.f32.gmra.mrb[14].mxu0 %vm371_vm0, %v370_v18 }
 0x13b   : > { %1693 = vmatprep.mubr.f32.mxu0 %v331_v19 }
 0x13d   : > { %v798_v14 = vpop.trf.xlu0 }
 0x141   : > { %v799_v15 = vpop.trf.xlu0 }
 0x156   : > { %v1660_v47 = vpop.f32.mrb[0].mxu1 }
 0x157   : > { %v672_v48 = vpop.f32.mrb[1].mxu1  ;;  %v698_v53 = vmul.f32 %v1660_v47, %v332_v46 }
 0x158   : > { %v697_v54 = vmul.f32 %v672_v48, %v331_v19 }
 0x1d5   : > { %v1632_v22 = vpop.f32.mrb[0].mxu0 }
 0x1d6   : > { %v486_v23 = vpop.f32.mrb[1].mxu0 }
 0x1d7   : > { %v1774_v24 = vpack.c.bf16 %v1632_v22, %v486_v23 }
 0x1d9   : > { %1775 = vmatprep.subr.bf16.mxu0 %v1774_v24 }
 0x1da   : > { %1777 = vmatpush3.bf16.msra.mxu0 %v1774_v24 }
 0x1dd   : > { %v1635_v25 = vpop.f32.mrb[2].mxu0 }
 0x1de   : > { %v496_v26 = vpop.f32.mrb[3].mxu0 }
 0x1df   : > { %v1778_v27 = vpack.c.bf16 %v1635_v25, %v496_v26 }
 0x1e1   : > { %1779 = vmatprep.subr.bf16.mxu0 %v1778_v27 }
 0x1e2   : > { %1781 = vmatpush3.bf16.msra.mxu0 %v1778_v27 }
 0x1e5   : > { %v1638_v28 = vpop.f32.mrb[4].mxu0 }
 0x1e6   : > { %v506_v29 = vpop.f32.mrb[5].mxu0 }
 0x1e7   : > { %v1782_v30 = vpack.c.bf16 %v1638_v28, %v506_v29 }
 0x1e9   : > { %1783 = vmatprep.subr.bf16.mxu0 %v1782_v30 }
 0x1ea   : > { %1785 = vmatpush3.bf16.msra.mxu0 %v1782_v30 }
 0x1ed   : > { %v1641_v31 = vpop.f32.mrb[6].mxu0 }
 0x1ee   : > { %v516_v32 = vpop.f32.mrb[7].mxu0 }
 0x1ef   : > { %v1786_v33 = vpack.c.bf16 %v1641_v31, %v516_v32 }
 0x1f1   : > { %1787 = vmatprep.subr.bf16.mxu0 %v1786_v33 }
 0x1f2   : > { %1789 = vmatpush3.bf16.msra.mxu0 %v1786_v33 }
 0x1f5   : > { %v1644_v34 = vpop.f32.mrb[8].mxu0 }
 0x1f6   : > { %v526_v35 = vpop.f32.mrb[9].mxu0 }
 0x1f7   : > { %v1790_v36 = vpack.c.bf16 %v1644_v34, %v526_v35 }
 0x1f9   : > { %1791 = vmatprep.subr.bf16.mxu0 %v1790_v36 }
 0x1fa   : > { %1793 = vmatpush3.bf16.msra.mxu0 %v1790_v36 }
 0x1fd   : > { %v1647_v37 = vpop.f32.mrb[10].mxu0 }
 0x1fe   : > { %v536_v38 = vpop.f32.mrb[11].mxu0 }
 0x1ff   : > { %v1794_v39 = vpack.c.bf16 %v1647_v37, %v536_v38 }
 0x201   : > { %1795 = vmatprep.subr.bf16.mxu0 %v1794_v39 }
 0x202   : > { %1797 = vmatpush3.bf16.msra.mxu0 %v1794_v39 }
 0x205   : > { %v1650_v40 = vpop.f32.mrb[12].mxu0 }
 0x206   : > { %v546_v41 = vpop.f32.mrb[13].mxu0 }
 0x207   : > { %v1798_v42 = vpack.c.bf16 %v1650_v40, %v546_v41 }
 0x209   : > { %1799 = vmatprep.subr.bf16.mxu0 %v1798_v42 }
 0x20a   : > { %1801 = vmatpush3.bf16.msra.mxu0 %v1798_v42 }
 0x20d   : > { %v1653_v43 = vpop.f32.mrb[14].mxu0 }
 0x20e   : > { %v556_v44 = vpop.f32.mrb[15].mxu0 }
 0x20f   : > { %v1802_v45 = vpack.c.bf16 %v1653_v43, %v556_v44 }
 0x211   : > { %1803 = vmatprep.subr.bf16.mxu0 %v1802_v45 }
 0x212   : > { %1805 = vmatpush3.bf16.msra.mxu0 %v1802_v45 }
 0x215   : > { %1694 = vmatmul.mubr.f32.vlgmr.msra.gmra.mrb[16].mxu0 %v332_v46 }
 0x216   : > { %1700 = vmatprep.mubr.msk.f32.mxu0 %vm371_vm0, %v798_v14 }
 0x2e8   : > { %v1695_v49 = vpop.f32.mrb[16].mxu0 }
 0x2e9   : > { %v771_v50 = vadd.f32 1e-08, %v1695_v49  ;;  %v765_v51 = vpop.f32.mrb[17].mxu0 }
 0x2ea   : > { %v766_v52 = vadd.f32 1e-08, %v765_v51 }
 0x2eb   : > { %1928 = vrcp.f32 %v771_v50 }
 0x2ec   : > { %1930 = vrcp.f32 %v766_v52 }
 0x2f5   : > { %v1929_v55 = vpop.eup %1928 }
 0x2f6   : > { %v1931_v56 = vpop.eup %1930  ;;  %v777_v57 = vmul.f32 %v1929_v55, %v698_v53 }
 0x2f7   : > { %v775_v58 = vmul.f32 %v1931_v56, %v697_v54 }
 0x2f8   : > { %779 = vst [vmem:[%s2443_s21 + $0x8] sm:$0xff] %v777_v57 }
 0x2f9   : > { %778 = vst [vmem:[%s2443_s21] sm:$0xff] %v775_v58  ;;  %v1806_v59 = vpack.c.bf16 %v777_v57, %v775_v58  ;;  %915 = vxpose.xlu1.b32.start [1/2] (short) %v775_v58, 128 }
 0x2fb   : > { %1807 = vmatprep.subr.bf16.mxu0 %v1806_v59  ;;  %1811 = vmatprep.subr.bf16.mxu1 %v1806_v59 }
 0x2fc   : > { %1809 = vmatpush3.bf16.msra.mxu0 %v1806_v59  ;;  %1813 = vmatpush3.bf16.msra.mxu1 %v1806_v59 }
 0x2fd   : > { %916 = vxpose.xlu1.b32.end [2/2] (short) %v777_v57, 128 }
 0x2ff   : > { %1701 = vmatmul.mubr.msk.f32.vlgmr.msra.gmra.mrb[18].mxu0 %vm371_vm0, %v799_v15 }
 0x379   : > { %v931_v60 = vpop.trf.xlu1 }
 0x37a   : > { %1707 = vmatprep.mubr.msk.f32.mxu1 %vm371_vm0, %v931_v60 }
 0x37d   : > { %v932_v61 = vpop.trf.xlu1 }
 0x37e   : > { %1708 = vmatmul.mubr.msk.f32.vlgmr.msra.gmra.mrb[2].mxu1 %vm371_vm0, %v932_v61 }
 0x381   : > { %v933_v62 = vpop.trf.xlu1 }
 0x382   : > { %1710 = vmatprep.mubr.msk.f32.mxu1 %vm371_vm0, %v933_v62 }
 0x385   : > { %v934_v63 = vpop.trf.xlu1 }
 0x386   : > { %1711 = vmatmul.mubr.msk.f32.gmra.mrb[4].mxu1 %vm371_vm0, %v934_v63 }
 0x389   : > { %v935_v2 = vpop.trf.xlu1 }
 0x38a   : > { %1713 = vmatprep.mubr.msk.f32.mxu1 %vm371_vm0, %v935_v2 }
 0x38d   : > { %v936_v3 = vpop.trf.xlu1 }
 0x38e   : > { %1714 = vmatmul.mubr.msk.f32.gmra.mrb[6].mxu1 %vm371_vm0, %v936_v3 }
 0x391   : > { %v937_v4 = vpop.trf.xlu1 }
 0x392   : > { %1716 = vmatprep.mubr.msk.f32.mxu1 %vm371_vm0, %v937_v4 }
 0x395   : > { %v938_v5 = vpop.trf.xlu1 }
 0x396   : > { %1717 = vmatmul.mubr.msk.f32.gmra.mrb[8].mxu1 %vm371_vm0, %v938_v5 }
 0x399   : > { %v939_v6 = vpop.trf.xlu1 }
 0x39a   : > { %1719 = vmatprep.mubr.msk.f32.mxu1 %vm371_vm0, %v939_v6 }
 0x39d   : > { %v940_v7 = vpop.trf.xlu1 }
 0x39e   : > { %1720 = vmatmul.mubr.msk.f32.gmra.mrb[10].mxu1 %vm371_vm0, %v940_v7 }
 0x3a1   : > { %v941_v8 = vpop.trf.xlu1 }
 0x3a2   : > { %1722 = vmatprep.mubr.msk.f32.mxu1 %vm371_vm0, %v941_v8 }
 0x3a5   : > { %v942_v9 = vpop.trf.xlu1 }
 0x3a6   : > { %1723 = vmatmul.mubr.msk.f32.gmra.mrb[12].mxu1 %vm371_vm0, %v942_v9 }
 0x3a9   : > { %v943_v10 = vpop.trf.xlu1 }
 0x3aa   : > { %1725 = vmatprep.mubr.msk.f32.mxu1 %vm371_vm0, %v943_v10 }
 0x3ad   : > { %v944_v11 = vpop.trf.xlu1 }
 0x3ae   : > { %1726 = vmatmul.mubr.msk.f32.gmra.mrb[14].mxu1 %vm371_vm0, %v944_v11 }
 0x3b1   : > { %v945_v12 = vpop.trf.xlu1 }
 0x3b2   : > { %1728 = vmatprep.mubr.msk.f32.mxu1 %vm371_vm0, %v945_v12 }
 0x3b5   : > { %v946_v13 = vpop.trf.xlu1 }
 0x3b6   : > { %1729 = vmatmul.mubr.msk.f32.gmra.mrb[16].mxu1 %vm371_vm0, %v946_v13 }
 0x3b7   : > { %1763 = vmatprep.mubr.f32.mxu1 %v2408_v0 }
 0x3d2   : > { %v1702_v40 = vpop.f32.mrb[18].mxu0 }
 0x3d3   : > { %v886_v41 = vpop.f32.mrb[19].mxu0 }
 0x451   : > { %v1709_v16 = vpop.f32.mrb[2].mxu1 }
 0x452   : > { %v1061_v17 = vpop.f32.mrb[3].mxu1 }
 0x453   : > { %v1814_v18 = vpack.c.bf16 %v1709_v16, %v1061_v17 }
 0x455   : > { %1815 = vmatprep.subr.bf16.mxu1 %v1814_v18 }
 0x456   : > { %1817 = vmatpush3.bf16.msra.mxu1 %v1814_v18 }
 0x459   : > { %v1712_v19 = vpop.f32.mrb[4].mxu1 }
 0x45a   : > { %v1071_v20 = vpop.f32.mrb[5].mxu1 }
 0x45b   : > { %v1818_v21 = vpack.c.bf16 %v1712_v19, %v1071_v20 }
 0x45d   : > { %1819 = vmatprep.subr.bf16.mxu1 %v1818_v21 }
 0x45e   : > { %1821 = vmatpush3.bf16.msra.mxu1 %v1818_v21 }
 0x461   : > { %v1715_v22 = vpop.f32.mrb[6].mxu1 }
 0x462   : > { %v1081_v23 = vpop.f32.mrb[7].mxu1 }
 0x463   : > { %v1822_v24 = vpack.c.bf16 %v1715_v22, %v1081_v23 }
 0x465   : > { %1823 = vmatprep.subr.bf16.mxu1 %v1822_v24 }
 0x466   : > { %1825 = vmatpush3.bf16.msra.mxu1 %v1822_v24 }
 0x469   : > { %v1718_v25 = vpop.f32.mrb[8].mxu1 }
 0x46a   : > { %v1091_v26 = vpop.f32.mrb[9].mxu1 }
 0x46b   : > { %v1826_v27 = vpack.c.bf16 %v1718_v25, %v1091_v26 }
 0x46d   : > { %1827 = vmatprep.subr.bf16.mxu1 %v1826_v27 }
 0x46e   : > { %1829 = vmatpush3.bf16.msra.mxu1 %v1826_v27 }
 0x471   : > { %v1721_v28 = vpop.f32.mrb[10].mxu1 }
 0x472   : > { %v1101_v29 = vpop.f32.mrb[11].mxu1 }
 0x473   : > { %v1830_v30 = vpack.c.bf16 %v1721_v28, %v1101_v29 }
 0x475   : > { %1831 = vmatprep.subr.bf16.mxu1 %v1830_v30 }
 0x476   : > { %1833 = vmatpush3.bf16.msra.mxu1 %v1830_v30 }
 0x479   : > { %v1724_v31 = vpop.f32.mrb[12].mxu1 }
 0x47a   : > { %v1111_v32 = vpop.f32.mrb[13].mxu1 }
 0x47b   : > { %v1834_v33 = vpack.c.bf16 %v1724_v31, %v1111_v32 }
 0x47d   : > { %1835 = vmatprep.subr.bf16.mxu1 %v1834_v33 }
 0x47e   : > { %1837 = vmatpush3.bf16.msra.mxu1 %v1834_v33 }
 0x481   : > { %v1727_v34 = vpop.f32.mrb[14].mxu1 }
 0x482   : > { %v1121_v35 = vpop.f32.mrb[15].mxu1 }
 0x483   : > { %v1838_v36 = vpack.c.bf16 %v1727_v34, %v1121_v35 }
 0x485   : > { %1839 = vmatprep.subr.bf16.mxu1 %v1838_v36 }
 0x486   : > { %1841 = vmatpush3.bf16.msra.mxu1 %v1838_v36 }
 0x489   : > { %v1730_v37 = vpop.f32.mrb[16].mxu1 }
 0x48a   : > { %v1131_v38 = vpop.f32.mrb[17].mxu1 }
 0x48b   : > { %v1842_v39 = vpack.c.bf16 %v1730_v37, %v1131_v38 }
 0x48d   : > { %1843 = vmatprep.subr.bf16.mxu1 %v1842_v39 }
 0x48e   : > { %1845 = vmatpush3.bf16.msra.mxu1 %v1842_v39 }
 0x491   : > { %1764 = vmatmul.mubr.f32.vlgmr.msra.gmra.mrb[18].mxu1 %v2410_v1 }
 0x492   : > { %2039 = shalt.err (!%p2036_p13)
}
 0x493   : > { %s2040_s6 = scalar_lea.hbm %s2476_s7, 256  ;;  %s2044_s26 = scalar_lea.hbm %s2570_s3, 512 }
 0x494   : > { %p2041_p11 = scmp.ne.s32.totalorder %s2476_s7, %s2040_s6  ;;  %p2045_p7 = scmp.lt.u32.totalorder %s2476_s7, %s2570_s3 }
 0x495   : > { %p2046_p4 = scmp.lt.u32.totalorder %s2044_s26, %s2040_s6  ;;  %p2048_p0 = scmp.lt.u32.totalorder %s2040_s6, %s2476_s7 }
 0x496   : > { %p2042_p2 = pnand %p2041_p11, %p2603_p10 }
 0x497   : > { %p2047_p3 = por %p2046_p4, %p2045_p7 }
 0x498   : > { %p2043_p5 = pneg %p2042_p2 }
 0x499   : > { %p2049_p8 = por %p2048_p0, %p2047_p3 }
 0x49b   : > { %p2050_p9 = pnand %p2049_p8, %p2043_p5 }
 0x49d   : > { %2053 = shalt.err (!%p2050_p9)
}
 0x49e   : > { %s2152_s13 = smov 128   ;;  %s2153_s19 = smov 8   ;;  %v1194_v46 = vmul.f32 %v1702_v40, %v2410_v1  ;;  %v1193_v47 = vmul.f32 %v886_v41, %v2408_v0 }
 0x49f   : > { %1852 = dma.vmem_to_hbm [thread:$0]  (%p2603_p10), %s2469_s27, 256, %s2476_s7, %s1277_s11, %s2152_s13, %s2152_s13, %s2153_s19  }
 0x4a0   : > { %s325_s21 = scalar_lea.vmem [#allocation12], %s2393_s14  ;;  %s2515_s7 = scalar_lea.hbm %s2571_s4, %s1544_s29 }
 0x4a1   : > { %s1313_s9 = sshll.u32 %s325_s21, 4  ;;  %s1282_s14 = scalar_lea.sflag [#allocation13], %s2390_s25  ;;  %s2508_s9 = int_to_ptr.vmem [resolvable:$true] %s1313_s9 }
 0x4a2   : > { %s2054_s11 = scalar_lea.vmem %s2508_s9, 256  ;;  %s2154_s12 = smov [#allocation12]  }
 0x4a3   : > { %p2055_p12 = scmp.ne.s32.totalorder %s2508_s9, %s2054_s11  ;;  %s2058_s20 = sshll.u32 %s2154_s12, 4  ;;  %s2059_s20 = int_to_ptr.vmem [resolvable:$false] %s2058_s20 }
 0x4a4   : > { %s2060_s1 = scalar_lea.vmem %s2059_s20, 512  ;;  %p2061_p13 = scmp.lt.s32.totalorder %s2508_s9, %s2059_s20 }
 0x4a5   : > { %p2056_p1 = pnand %p2055_p12, %p2603_p10  ;;  %p2062_p11 = scmp.lt.s32.totalorder %s2060_s1, %s2054_s11 }
 0x4a7   : > { %p2057_p6 = pneg %p2056_p1  ;;  %p2063_p2 = por %p2062_p11, %p2061_p13 }
 0x4a9   : > { %p2064_p5 = pnand %p2063_p2, %p2057_p6 }
 0x564   : > { %v1765_v42 = vpop.f32.mrb[18].mxu1 }
 0x565   : > { %v1267_v43 = vadd.f32 1e-08, %v1765_v42  ;;  %v1261_v44 = vpop.f32.mrb[19].mxu1 }
 0x566   : > { %v1262_v45 = vadd.f32 1e-08, %v1261_v44 }
 0x567   : > { %1932 = vrcp.f32 %v1267_v43 }
 0x568   : > { %1934 = vrcp.f32 %v1262_v45 }
 0x571   : > { %v1933_v48 = vpop.eup %1932 }
 0x572   : > { %v1935_v49 = vpop.eup %1934  ;;  %v1273_v50 = vmul.f32 %v1933_v48, %v1194_v46 }
 0x573   : > { %v1271_v51 = vmul.f32 %v1935_v49, %v1193_v47 }
 0x574   : > { %1275 = vst [vmem:[%s325_s21 + $0x8] sm:$0xff] %v1273_v50 }
 0x575   : > { %1274 = vst [vmem:[%s325_s21] sm:$0xff] %v1271_v51 }
 0x576   : > { %2067 = shalt.err (!%p2064_p5)
}
 0x577   : > { %s2068_s18 = scalar_lea.hbm %s2515_s7, 256  ;;  %s2072_s6 = scalar_lea.hbm %s2571_s4, 512 }
 0x578   : > { %p2069_p7 = scmp.ne.s32.totalorder %s2515_s7, %s2068_s18  ;;  %p2073_p0 = scmp.lt.u32.totalorder %s2515_s7, %s2571_s4 }
 0x579   : > { %p2074_p8 = scmp.lt.u32.totalorder %s2072_s6, %s2068_s18  ;;  %p2076_p12 = scmp.lt.u32.totalorder %s2068_s18, %s2515_s7 }
 0x57a   : > { %p2070_p4 = pnand %p2069_p7, %p2603_p10 }
 0x57b   : > { %p2075_p9 = por %p2074_p8, %p2073_p0 }
 0x57c   : > { %p2071_p3 = pneg %p2070_p4 }
 0x57d   : > { %p2077_p1 = por %p2076_p12, %p2075_p9 }
 0x57f   : > { %p2078_p6 = pnand %p2077_p1, %p2071_p3 }
 0x581   : > { %2081 = shalt.err (!%p2078_p6)
}
 0x582   : > { %1853 = dma.vmem_to_hbm [thread:$0]  (%p2603_p10), %s2508_s9, 256, %s2515_s7, %s1282_s14, %s2152_s13, %s2152_s13, %s2153_s19  }
 0x583 PF: > { %s2604_s26 = sld [smem:[#allocation19_spill]]  ;;  %s1328_s22 = sand.u32 1, %s2124_s15  }
 0x584   : > { %p2605_p13 = scmp.ne.s32.totalorder %s2591_s30, 0  ;;  %s1329_s24 = scalar_lea.sflag [#allocation7], %s1328_s22 }
 0x589   : > { %p2606_p11 = scmp.ge.s32.totalorder %s2604_s26, 2 }
 0x58b   : > { %p1867_p2 = pnand %p2606_p11, %p2605_p13 }
 0x58d   : > { %2115 = dma.done.wait (!%p1867_p2), %s1329_s24, 256  }
 0x58e   : > { %2117 = vsyncadd (!%p1867_p2), %s1329_s24, 4294967040  ;;  %s1338_s28 = scalar_lea.sflag [#allocation13], %s1328_s22 }
 0x58f   : > { %2119 = dma.done.wait (!%p1867_p2), %s1338_s28, 256  }
 0x590   : > { %2121 = vsyncadd (!%p1867_p2), %s1338_s28, 4294967040  ;;  %s27_s20 = sadd.s32 1, %s2604_s26   ;;  %s2607_s25 = sld [smem:[#allocation21_spill]] }
 0x591   : > { %p24_p5 = scmp.ge.s32.totalorder %s27_s20, 4   ;;  %s2608_s18 = sld [smem:[#allocation18_spill]] }
 0x592   : > { %s2609_s19 = sld [smem:[#allocation20_spill]]  ;;  %s2610_s15 = smov %s2128_s16 }
 0x593   : > { %s2611_s16 = smov %s2132_s17  ;;  %26 = sbr.rel (!%p24_p5) target bundleno = 12 (0xc), region = 126 }
 0x596   : > { %s2612_s17 = smov %s2607_s25 }
 0x59a   :  { %1343 = vsyncpa [#allocation6], 1 }
 0x59b   :  { %1345 = vsyncpa [#allocation6 + $0x1], 1 }
 0x59c   :  { %1346 = vsyncpa [#allocation9], 1 }
 0x59d   :  { %1348 = vsyncpa [#allocation9 + $0x1], 1 }
 0x59e   :  { %1349 = vsyncpa [#allocation7], 1 }
 0x59f   :  { %1351 = vsyncpa [#allocation7 + $0x1], 1 }
 0x5a0   :  { %1352 = vsyncpa [#allocation13], 1 }
 0x5a1   :  { %1354 = vsyncpa [#allocation13 + $0x1], 1 }

</bundles_post_ra>
